<compile_context>
chip_gen: v7x
topology: tpu7x:2x2x1
jax: 0.10.0
libtpu: 0.0.40
codegen_flags: <defaults>
</compile_context>

<pallas_src>
import functools

import jax
import jax.numpy as jnp
from jax import lax
from jax.experimental import pallas as pl
from jax.experimental.pallas import tpu as pltpu

K = 7      # kernel_size (module default; must be 3 or 7)
PAD = 3    # padding = 3 if kernel_size == 7 else 1

_VMEM_LIMIT = 32 * 1024 * 1024   # scoped-VMEM limit (raises v5e's 16 MiB default)


# ---------------------------------------------------------------- pass 1: channel reduce
def _reduce_kernel(x_ref, cat_ref, *, HW):
    # x_ref: (1, C, tD, HW) block;  cat_ref: (1, tD, 2*HW) bf16
    xv = x_ref[0].astype(jnp.float32)                              # (C, tD, HW)
    cat_ref[0, :, 0:HW] = jnp.mean(xv, axis=0).astype(cat_ref.dtype)   # torch.mean(dim=1)
    cat_ref[0, :, HW:2 * HW] = jnp.max(xv, axis=0).astype(cat_ref.dtype)  # torch.max(dim=1)


# ---------------------------------------------------------------- pass 2: conv + sigmoid
def _conv_sigmoid_kernel(cat_ref, t_ref, att_ref, acc_ref, *, D):
    # cat_ref: (1, D, 2*HW) bf16   [avg | max] concatenated along the lane axis
    # t_ref:   (K, 2*HW, HW) bf16  banded Toeplitz matrices (one per kd)
    # att_ref: (1, D, HW)   bf16   sigmoid(conv) gate (lane-dense)
    # acc_ref: (D, HW)      f32    VMEM accumulator scratch
    acc_ref[...] = jnp.zeros_like(acc_ref)
    # Conv3d(2->1, k=K, pad=PAD, bias=False): per kd one MXU matmul whose Toeplitz
    # folds c/kh/kw and the H/W zero padding; the D zero padding is realized by
    # range-limiting the output/input rows of each kd tap (no padded scratch copy).
    for kd in range(K):
        shift = kd - PAD                       # input depth = output depth + shift
        lo_out, hi_out = max(0, -shift), D - max(0, shift)
        if hi_out <= lo_out:                   # tap lies entirely in the D zero padding
            continue
        lo_in = lo_out + shift
        slab = cat_ref[0, lo_in:lo_in + (hi_out - lo_out), :]       # (M, 2*HW) bf16
        acc_ref[lo_out:hi_out, :] += jnp.dot(
            slab, t_ref[kd], preferred_element_type=jnp.float32)    # MXU, f32 acc
    att_ref[0] = jax.nn.sigmoid(acc_ref[...]).astype(att_ref.dtype)


# ---------------------------------------------------------------- pass 3: gate * x
def _apply_kernel(x_ref, att_ref, o_ref):
    # x_ref: (1, C, TS);  att_ref: (1, 1, TS) bf16;  o_ref: (1, C, TS)  (lane-dense)
    gate = att_ref[0].astype(jnp.float32)                           # (1, TS)
    o_ref[0] = (x_ref[0].astype(jnp.float32) * gate).astype(o_ref.dtype)


# ---------------------------------------------------------------- helpers / wrapper
def _pick_lane_tile(total, rows, bytes_per_el, budget=2 * 1024 * 1024):
    """Largest lane tile (128-multiple dividing `total`) with rows*tile*bytes<=budget."""
    if rows * total * bytes_per_el <= budget or total % 128 != 0:
        # TODO(synk): pad S to a 128-multiple for huge, awkwardly factored volumes.
        return total
    cands = [t for t in range(128, total, 128)
             if total % t == 0 and rows * t * bytes_per_el <= budget]
    return max(cands) if cands else 128


def _pick_d_tile(D, C, HW, bytes_per_el, budget=2 * 1024 * 1024):
    """Largest tD dividing D (tD % 8 == 0 or tD == D) with C*tD*HW*bytes <= budget."""
    if C * D * HW * bytes_per_el <= budget:
        return D
    cands = [t for t in range(8, D, 8)
             if D % t == 0 and C * t * HW * bytes_per_el <= budget]
    return max(cands) if cands else D


def _toeplitz_hw(conv_w, H, W):
    """(1,2,K,K,K) -> (K, 2*H*W, H*W) bf16 banded matrices.

    t[kd][c*H*W + hi*W + wi, ho*W + wo] = conv_w[0, c, kd, hi-ho+PAD, wi-wo+PAD],
    zero when the kh/kw tap index falls outside [0, K) (this also encodes the
    H/W-side zero padding of the convolution).
    """
    HW = H * W
    kh = jnp.arange(H)[:, None] - jnp.arange(H)[None, :] + PAD      # (H_in, H_out)
    kw = jnp.arange(W)[:, None] - jnp.arange(W)[None, :] + PAD      # (W_in, W_out)
    vh = (kh >= 0) & (kh < K)
    vw = (kw >= 0) & (kw < K)
    khc = jnp.clip(kh, 0, K - 1)
    kwc = jnp.clip(kw, 0, K - 1)
    w = conv_w[0].astype(jnp.float32)                                # (2, K, K, K)
    taps = w[:, :, khc[:, :, None, None], kwc[None, None, :, :]]     # (2,K,H,H,W,W)
    mask = vh[:, :, None, None] & vw[None, None, :, :]               # (H,H,W,W)
    taps = jnp.where(mask[None, None], taps, 0.0)
    # (c, kd, hi, ho, wi, wo) -> (kd, c, hi, wi, ho, wo) -> (K, 2*HW, HW)
    t = jnp.transpose(taps, (1, 0, 2, 4, 3, 5)).reshape(K, 2 * HW, HW)
    return t.astype(jnp.bfloat16)


@jax.jit
def spatial_attention(x, conv_w):
    """x: (N, C, D, H, W) float.  conv_w: (1, 2, K, K, K) float (no bias)."""
    N, C, D, H, W = x.shape
    HW = H * W
    S = D * HW
    itemsize = x.dtype.itemsize

    t = _toeplitz_hw(conv_w, H, W)

    # Gate: the kh/kw-folded Toeplitz + whole-depth per-batch blocks must fit VMEM.
    pass2_bytes = (2 * t.size * t.dtype.itemsize      # Toeplitz (double-buffered)
                   + 2 * D * 2 * HW * 2                # cat block
                   + 2 * D * HW * 2                    # att block
                   + D * HW * 4)                       # f32 accumulator
    if pass2_bytes > _VMEM_LIMIT // 2:
        # TODO(synk): tile the H*W (banded) and D (kd-halo) axes of the Toeplitz
        # conv for large volumes instead of one whole-volume block per batch.
        raise NotImplementedError(
            f"volume too large for the single-block Toeplitz conv pass "
            f"({pass2_bytes} bytes of VMEM needed)")

    x4 = x.reshape(N, C, D, HW)

    # ---- pass 1: channel mean/max -> (N, D, 2*HW) bf16 ([avg | max] along lanes) ----
    tD = _pick_d_tile(D, C, HW, itemsize)
    cat = pl.pallas_call(
        functools.partial(_reduce_kernel, HW=HW),
        out_shape=jax.ShapeDtypeStruct((N, D, 2 * HW), jnp.bfloat16),
        grid_spec=pltpu.PrefetchScalarGridSpec(
            num_scalar_prefetch=0,
            grid=(N, D // tD),
            in_specs=[pl.BlockSpec((1, C, tD, HW), lambda n, d: (n, 0, d, 0))],
            out_specs=pl.BlockSpec((1, tD, 2 * HW), lambda n, d: (n, d, 0)),
        ),
        compiler_params=pltpu.CompilerParams(
            dimension_semantics=("parallel", "parallel"),
            vmem_limit_bytes=_VMEM_LIMIT),
    )(x4)

    # ---- pass 2: K banded-Toeplitz bf16 MXU matmuls + sigmoid -> (N, D, HW) bf16 ----
    # TODO(synk): split D into the grid (kd halo of PAD rows per tile) for very deep
    #             volumes / deeper pipelining on v7x's 64 MiB VMEM.
    att = pl.pallas_call(
        functools.partial(_conv_sigmoid_kernel, D=D),
        out_shape=jax.ShapeDtypeStruct((N, D, HW), jnp.bfloat16),
        grid_spec=pltpu.PrefetchScalarGridSpec(
            num_scalar_prefetch=0,
            grid=(N,),
            in_specs=[
                pl.BlockSpec((1, D, 2 * HW), lambda n: (n, 0, 0)),
                pl.BlockSpec((K, 2 * HW, HW), lambda n: (0, 0, 0)),
            ],
            out_specs=pl.BlockSpec((1, D, HW), lambda n: (n, 0, 0)),
            scratch_shapes=[pltpu.VMEM((D, HW), jnp.float32)],
        ),
        compiler_params=pltpu.CompilerParams(
            dimension_semantics=("parallel",),
            vmem_limit_bytes=_VMEM_LIMIT),
    )(cat, t)

    # ---- pass 3: out = sigmoid(conv) * x, lane-dense over flattened spatial ----
    xr = x.reshape(N, C, S)
    ts3 = _pick_lane_tile(S, 2 * C + 1, itemsize)
    out = pl.pallas_call(
        _apply_kernel,
        out_shape=jax.ShapeDtypeStruct((N, C, S), x.dtype),
        grid_spec=pltpu.PrefetchScalarGridSpec(
            num_scalar_prefetch=0,
            grid=(N, S // ts3),
            in_specs=[
                pl.BlockSpec((1, C, ts3), lambda n, s: (n, 0, s)),
                pl.BlockSpec((1, 1, ts3), lambda n, s: (n, 0, s)),
            ],
            out_specs=pl.BlockSpec((1, C, ts3), lambda n, s: (n, 0, s)),
        ),
        compiler_params=pltpu.CompilerParams(
            dimension_semantics=("parallel", "parallel"),
            vmem_limit_bytes=_VMEM_LIMIT),
    )(xr, att.reshape(N, 1, S))

    return out.reshape(N, C, D, H, W)


def reference(x, conv_w):
    """Pure-JAX reference matching the PyTorch forward exactly."""
    avg = jnp.mean(x, axis=1, keepdims=True)
    mx = jnp.max(x, axis=1, keepdims=True)
    cat = jnp.concatenate([avg, mx], axis=1)
    conv = lax.conv_general_dilated(
        cat, conv_w, window_strides=(1, 1, 1),
        padding=[(PAD, PAD)] * 3,
        dimension_numbers=("NCDHW", "OIDHW", "NCDHW"),
        precision=lax.Precision.HIGHEST)
    return jax.nn.sigmoid(conv) * x


if __name__ == "__main__":
    key = jax.random.PRNGKey(0)
    kx, kw_key = jax.random.split(key)

    # small shapes consistent with a Conv3d-based module: N, C, D, H, W
    N, C, D, H, W = 2, 4, 8, 8, 8
    x = jax.random.normal(kx, (N, C, D, H, W), jnp.float32)

    # deterministic weight init (PyTorch Conv3d default kaiming_uniform bound)
    fan_in = 2 * K * K * K
    bound = 1.0 / (fan_in ** 0.5)
    conv_w = jax.random.uniform(kw_key, (1, 2, K, K, K), jnp.float32, -bound, bound)

    out = jax.block_until_ready(spatial_attention(x, conv_w))

    ref = reference(x, conv_w)
    assert out.shape == ref.shape and out.dtype == ref.dtype
    # Tolerance covers bf16 MXU operands and bf16 cat/att intermediates; the sigmoid
    # gate is numerically benign, so errors stay well below this.
    if not jnp.allclose(out, ref, rtol=1e-2, atol=2e-2):
        raise AssertionError(
            f"mismatch vs reference, max abs err = {jnp.max(jnp.abs(out - ref))}")
    print("KERNEL_OK")
</pallas_src>

<mosaic_0001>
module attributes {stable_mosaic.version = 11 : i64} {
  func.func @_reduce_kernel(%arg0: i32, %arg1: i32, %arg2: memref<1x4x8x64xf32, #tpu.memory_space<vmem>>, %arg3: memref<1x8x128xbf16, #tpu.memory_space<vmem>>) attributes {dimension_semantics = [#tpu.dimension_semantics<parallel>, #tpu.dimension_semantics<parallel>], iteration_bounds = array<i64: 2, 1>, scalar_prefetch = 0 : i64, scratch_operands = 0 : i64, tpu.core_type = #tpu.core_type<tc>, window_params = [{transform_indices = @transform_0, window_bounds = array<i64: 1, 4, 8, 64>}, {transform_indices = @transform_1, window_bounds = array<i64: 1, 8, 128>}]} {
    %c0 = arith.constant 0 : index
    %c0_0 = arith.constant 0 : index
    %c0_1 = arith.constant 0 : index
    %c0_2 = arith.constant 0 : index
    %0 = vector.load %arg2[%c0, %c0_0, %c0_1, %c0_2] : memref<1x4x8x64xf32, #tpu.memory_space<vmem>>, vector<1x4x8x64xf32>
    %1 = vector.shape_cast %0 : vector<1x4x8x64xf32> to vector<4x8x64xf32>
    %cst = arith.constant dense<0.000000e+00> : vector<8x64xf32>
    %2 = vector.multi_reduction <add>, %1, %cst [0] : vector<4x8x64xf32> to vector<8x64xf32>
    %cst_3 = arith.constant 4.000000e+00 : f32
    %3 = vector.broadcast %cst_3 : f32 to vector<8x64xf32>
    %4 = arith.divf %2, %3 : vector<8x64xf32>
    %5 = arith.truncf %4 : vector<8x64xf32> to vector<8x64xbf16>
    %c0_4 = arith.constant 0 : index
    %c0_5 = arith.constant 0 : index
    %c0_6 = arith.constant 0 : index
    %6 = vector.load %arg3[%c0_4, %c0_5, %c0_6] : memref<1x8x128xbf16, #tpu.memory_space<vmem>>, vector<1x8x64xbf16>
    %7 = vector.shape_cast %6 : vector<1x8x64xbf16> to vector<8x64xbf16>
    %8 = vector.shape_cast %5 : vector<8x64xbf16> to vector<1x8x64xbf16>
    tpu.vector_store %arg3[%c0_4, %c0_5, %c0_6], %8 {strides = array<i32>} : memref<1x8x128xbf16, #tpu.memory_space<vmem>>, vector<1x8x64xbf16>,
    %cst_7 = arith.constant dense<0xFF800000> : vector<8x64xf32>
    %9 = vector.multi_reduction <maximumf>, %1, %cst_7 [0] : vector<4x8x64xf32> to vector<8x64xf32>
    %10 = arith.truncf %9 : vector<8x64xf32> to vector<8x64xbf16>
    %c0_8 = arith.constant 0 : index
    %c0_9 = arith.constant 0 : index
    %c64 = arith.constant 64 : index
    %11 = vector.load %arg3[%c0_8, %c0_9, %c64] : memref<1x8x128xbf16, #tpu.memory_space<vmem>>, vector<1x8x64xbf16>
    %12 = vector.shape_cast %11 : vector<1x8x64xbf16> to vector<8x64xbf16>
    %13 = vector.shape_cast %10 : vector<8x64xbf16> to vector<1x8x64xbf16>
    tpu.vector_store %arg3[%c0_8, %c0_9, %c64], %13 {strides = array<i32>} : memref<1x8x128xbf16, #tpu.memory_space<vmem>>, vector<1x8x64xbf16>,
    return
  }
  func.func @transform_0(%arg0: i32, %arg1: i32) -> (i32, i32, i32, i32) {
    %c0_i32 = arith.constant 0 : i32
    %c0_i32_0 = arith.constant 0 : i32
    %c0_i32_1 = arith.constant 0 : i32
    return %arg0, %c0_i32, %arg1, %c0_i32_0 : i32, i32, i32, i32
  }
  func.func @transform_1(%arg0: i32, %arg1: i32) -> (i32, i32, i32) {
    %c0_i32 = arith.constant 0 : i32
    %c0_i32_0 = arith.constant 0 : i32
    return %arg0, %arg1, %c0_i32 : i32, i32, i32
  }
}

module attributes {stable_mosaic.version = 11 : i64} {
  func.func @_conv_sigmoid_kernel(%arg0: i32, %arg1: memref<1x8x128xbf16, #tpu.memory_space<vmem>>, %arg2: memref<7x128x64xbf16, #tpu.memory_space<vmem>>, %arg3: memref<1x8x64xbf16, #tpu.memory_space<vmem>>, %arg4: memref<8x64xf32, #tpu.memory_space<vmem>>) attributes {dimension_semantics = [#tpu.dimension_semantics<parallel>], iteration_bounds = array<i64: 2>, scalar_prefetch = 0 : i64, scratch_operands = 1 : i64, tpu.core_type = #tpu.core_type<tc>, window_params = [{transform_indices = @transform_0, window_bounds = array<i64: 1, 8, 128>}, {pipeline_mode = #tpu.pipeline_mode<synchronous>, transform_indices = @transform_1, window_bounds = array<i64: 7, 128, 64>}, {transform_indices = @transform_2, window_bounds = array<i64: 1, 8, 64>}]} {
    %cst = arith.constant 0.000000e+00 : f32
    %0 = vector.broadcast %cst : f32 to vector<8x64xf32>
    %c0 = arith.constant 0 : index
    %c0_0 = arith.constant 0 : index
    %1 = vector.load %arg4[%c0, %c0_0] : memref<8x64xf32, #tpu.memory_space<vmem>>, vector<8x64xf32>
    tpu.vector_store %arg4[%c0, %c0_0], %0 {strides = array<i32>} : memref<8x64xf32, #tpu.memory_space<vmem>>, vector<8x64xf32>,
    %c0_1 = arith.constant 0 : index
    %c0_2 = arith.constant 0 : index
    %c0_3 = arith.constant 0 : index
    %2 = vector.load %arg1[%c0_1, %c0_2, %c0_3] : memref<1x8x128xbf16, #tpu.memory_space<vmem>>, vector<1x5x128xbf16>
    %3 = vector.shape_cast %2 : vector<1x5x128xbf16> to vector<5x128xbf16>
    %c3 = arith.constant 3 : index
    %c0_4 = arith.constant 0 : index
    %4 = vector.load %arg4[%c3, %c0_4] : memref<8x64xf32, #tpu.memory_space<vmem>>, vector<5x64xf32>
    %c0_5 = arith.constant 0 : index
    %c0_6 = arith.constant 0 : index
    %c0_7 = arith.constant 0 : index
    %5 = vector.load %arg2[%c0_5, %c0_6, %c0_7] : memref<7x128x64xbf16, #tpu.memory_space<vmem>>, vector<1x128x64xbf16>
    %6 = vector.shape_cast %5 : vector<1x128x64xbf16> to vector<128x64xbf16>
    %cst_8 = arith.constant dense<0.000000e+00> : vector<5x64xf32>
    %7 = tpu.matmul %3, %6, %cst_8 {dimension_numbers = #tpu.dot_dimension_numbers<[1], [0], [0], [1], [0, 0, 1, 1], [], []>} : vector<5x128xbf16>, vector<128x64xbf16>, vector<5x64xf32> -> vector<5x64xf32>
    %8 = arith.addf %4, %7 : vector<5x64xf32>
    %c3_9 = arith.constant 3 : index
    %c0_10 = arith.constant 0 : index
    %9 = vector.load %arg4[%c3_9, %c0_10] : memref<8x64xf32, #tpu.memory_space<vmem>>, vector<5x64xf32>
    tpu.vector_store %arg4[%c3_9, %c0_10], %8 {strides = array<i32>} : memref<8x64xf32, #tpu.memory_space<vmem>>, vector<5x64xf32>,
    %c0_11 = arith.constant 0 : index
    %c0_12 = arith.constant 0 : index
    %c0_13 = arith.constant 0 : index
    %10 = vector.load %arg1[%c0_11, %c0_12, %c0_13] : memref<1x8x128xbf16, #tpu.memory_space<vmem>>, vector<1x6x128xbf16>
    %11 = vector.shape_cast %10 : vector<1x6x128xbf16> to vector<6x128xbf16>
    %c2 = arith.constant 2 : index
    %c0_14 = arith.constant 0 : index
    %12 = vector.load %arg4[%c2, %c0_14] : memref<8x64xf32, #tpu.memory_space<vmem>>, vector<6x64xf32>
    %c1 = arith.constant 1 : index
    %c0_15 = arith.constant 0 : index
    %c0_16 = arith.constant 0 : index
    %13 = vector.load %arg2[%c1, %c0_15, %c0_16] : memref<7x128x64xbf16, #tpu.memory_space<vmem>>, vector<1x128x64xbf16>
    %14 = vector.shape_cast %13 : vector<1x128x64xbf16> to vector<128x64xbf16>
    %cst_17 = arith.constant dense<0.000000e+00> : vector<6x64xf32>
    %15 = tpu.matmul %11, %14, %cst_17 {dimension_numbers = #tpu.dot_dimension_numbers<[1], [0], [0], [1], [0, 0, 1, 1], [], []>} : vector<6x128xbf16>, vector<128x64xbf16>, vector<6x64xf32> -> vector<6x64xf32>
    %16 = arith.addf %12, %15 : vector<6x64xf32>
    %c2_18 = arith.constant 2 : index
    %c0_19 = arith.constant 0 : index
    %17 = vector.load %arg4[%c2_18, %c0_19] : memref<8x64xf32, #tpu.memory_space<vmem>>, vector<6x64xf32>
    tpu.vector_store %arg4[%c2_18, %c0_19], %16 {strides = array<i32>} : memref<8x64xf32, #tpu.memory_space<vmem>>, vector<6x64xf32>,
    %c0_20 = arith.constant 0 : index
    %c0_21 = arith.constant 0 : index
    %c0_22 = arith.constant 0 : index
    %18 = vector.load %arg1[%c0_20, %c0_21, %c0_22] : memref<1x8x128xbf16, #tpu.memory_space<vmem>>, vector<1x7x128xbf16>
    %19 = vector.shape_cast %18 : vector<1x7x128xbf16> to vector<7x128xbf16>
    %c1_23 = arith.constant 1 : index
    %c0_24 = arith.constant 0 : index
    %20 = vector.load %arg4[%c1_23, %c0_24] : memref<8x64xf32, #tpu.memory_space<vmem>>, vector<7x64xf32>
    %c2_25 = arith.constant 2 : index
    %c0_26 = arith.constant 0 : index
    %c0_27 = arith.constant 0 : index
    %21 = vector.load %arg2[%c2_25, %c0_26, %c0_27] : memref<7x128x64xbf16, #tpu.memory_space<vmem>>, vector<1x128x64xbf16>
    %22 = vector.shape_cast %21 : vector<1x128x64xbf16> to vector<128x64xbf16>
    %cst_28 = arith.constant dense<0.000000e+00> : vector<7x64xf32>
    %23 = tpu.matmul %19, %22, %cst_28 {dimension_numbers = #tpu.dot_dimension_numbers<[1], [0], [0], [1], [0, 0, 1, 1], [], []>} : vector<7x128xbf16>, vector<128x64xbf16>, vector<7x64xf32> -> vector<7x64xf32>
    %24 = arith.addf %20, %23 : vector<7x64xf32>
    %c1_29 = arith.constant 1 : index
    %c0_30 = arith.constant 0 : index
    %25 = vector.load %arg4[%c1_29, %c0_30] : memref<8x64xf32, #tpu.memory_space<vmem>>, vector<7x64xf32>
    tpu.vector_store %arg4[%c1_29, %c0_30], %24 {strides = array<i32>} : memref<8x64xf32, #tpu.memory_space<vmem>>, vector<7x64xf32>,
    %c0_31 = arith.constant 0 : index
    %c0_32 = arith.constant 0 : index
    %c0_33 = arith.constant 0 : index
    %26 = vector.load %arg1[%c0_31, %c0_32, %c0_33] : memref<1x8x128xbf16, #tpu.memory_space<vmem>>, vector<1x8x128xbf16>
    %27 = vector.shape_cast %26 : vector<1x8x128xbf16> to vector<8x128xbf16>
    %c0_34 = arith.constant 0 : index
    %c0_35 = arith.constant 0 : index
    %28 = vector.load %arg4[%c0_34, %c0_35] : memref<8x64xf32, #tpu.memory_space<vmem>>, vector<8x64xf32>
    %c3_36 = arith.constant 3 : index
    %c0_37 = arith.constant 0 : index
    %c0_38 = arith.constant 0 : index
    %29 = vector.load %arg2[%c3_36, %c0_37, %c0_38] : memref<7x128x64xbf16, #tpu.memory_space<vmem>>, vector<1x128x64xbf16>
    %30 = vector.shape_cast %29 : vector<1x128x64xbf16> to vector<128x64xbf16>
    %cst_39 = arith.constant dense<0.000000e+00> : vector<8x64xf32>
    %31 = tpu.matmul %27, %30, %cst_39 {dimension_numbers = #tpu.dot_dimension_numbers<[1], [0], [0], [1], [0, 0, 1, 1], [], []>} : vector<8x128xbf16>, vector<128x64xbf16>, vector<8x64xf32> -> vector<8x64xf32>
    %32 = arith.addf %28, %31 : vector<8x64xf32>
    %c0_40 = arith.constant 0 : index
    %c0_41 = arith.constant 0 : index
    %33 = vector.load %arg4[%c0_40, %c0_41] : memref<8x64xf32, #tpu.memory_space<vmem>>, vector<8x64xf32>
    tpu.vector_store %arg4[%c0_40, %c0_41], %32 {strides = array<i32>} : memref<8x64xf32, #tpu.memory_space<vmem>>, vector<8x64xf32>,
    %c0_42 = arith.constant 0 : index
    %c1_43 = arith.constant 1 : index
    %c0_44 = arith.constant 0 : index
    %34 = vector.load %arg1[%c0_42, %c1_43, %c0_44] : memref<1x8x128xbf16, #tpu.memory_space<vmem>>, vector<1x7x128xbf16>
    %35 = vector.shape_cast %34 : vector<1x7x128xbf16> to vector<7x128xbf16>
    %c0_45 = arith.constant 0 : index
    %c0_46 = arith.constant 0 : index
    %36 = vector.load %arg4[%c0_45, %c0_46] : memref<8x64xf32, #tpu.memory_space<vmem>>, vector<7x64xf32>
    %c4 = arith.constant 4 : index
    %c0_47 = arith.constant 0 : index
    %c0_48 = arith.constant 0 : index
    %37 = vector.load %arg2[%c4, %c0_47, %c0_48] : memref<7x128x64xbf16, #tpu.memory_space<vmem>>, vector<1x128x64xbf16>
    %38 = vector.shape_cast %37 : vector<1x128x64xbf16> to vector<128x64xbf16>
    %cst_49 = arith.constant dense<0.000000e+00> : vector<7x64xf32>
    %39 = tpu.matmul %35, %38, %cst_49 {dimension_numbers = #tpu.dot_dimension_numbers<[1], [0], [0], [1], [0, 0, 1, 1], [], []>} : vector<7x128xbf16>, vector<128x64xbf16>, vector<7x64xf32> -> vector<7x64xf32>
    %40 = arith.addf %36, %39 : vector<7x64xf32>
    %c0_50 = arith.constant 0 : index
    %c0_51 = arith.constant 0 : index
    %41 = vector.load %arg4[%c0_50, %c0_51] : memref<8x64xf32, #tpu.memory_space<vmem>>, vector<7x64xf32>
    tpu.vector_store %arg4[%c0_50, %c0_51], %40 {strides = array<i32>} : memref<8x64xf32, #tpu.memory_space<vmem>>, vector<7x64xf32>,
    %c0_52 = arith.constant 0 : index
    %c2_53 = arith.constant 2 : index
    %c0_54 = arith.constant 0 : index
    %42 = vector.load %arg1[%c0_52, %c2_53, %c0_54] : memref<1x8x128xbf16, #tpu.memory_space<vmem>>, vector<1x6x128xbf16>
    %43 = vector.shape_cast %42 : vector<1x6x128xbf16> to vector<6x128xbf16>
    %c0_55 = arith.constant 0 : index
    %c0_56 = arith.constant 0 : index
    %44 = vector.load %arg4[%c0_55, %c0_56] : memref<8x64xf32, #tpu.memory_space<vmem>>, vector<6x64xf32>
    %c5 = arith.constant 5 : index
    %c0_57 = arith.constant 0 : index
    %c0_58 = arith.constant 0 : index
    %45 = vector.load %arg2[%c5, %c0_57, %c0_58] : memref<7x128x64xbf16, #tpu.memory_space<vmem>>, vector<1x128x64xbf16>
    %46 = vector.shape_cast %45 : vector<1x128x64xbf16> to vector<128x64xbf16>
    %cst_59 = arith.constant dense<0.000000e+00> : vector<6x64xf32>
    %47 = tpu.matmul %43, %46, %cst_59 {dimension_numbers = #tpu.dot_dimension_numbers<[1], [0], [0], [1], [0, 0, 1, 1], [], []>} : vector<6x128xbf16>, vector<128x64xbf16>, vector<6x64xf32> -> vector<6x64xf32>
    %48 = arith.addf %44, %47 : vector<6x64xf32>
    %c0_60 = arith.constant 0 : index
    %c0_61 = arith.constant 0 : index
    %49 = vector.load %arg4[%c0_60, %c0_61] : memref<8x64xf32, #tpu.memory_space<vmem>>, vector<6x64xf32>
    tpu.vector_store %arg4[%c0_60, %c0_61], %48 {strides = array<i32>} : memref<8x64xf32, #tpu.memory_space<vmem>>, vector<6x64xf32>,
    %c0_62 = arith.constant 0 : index
    %c3_63 = arith.constant 3 : index
    %c0_64 = arith.constant 0 : index
    %50 = vector.load %arg1[%c0_62, %c3_63, %c0_64] : memref<1x8x128xbf16, #tpu.memory_space<vmem>>, vector<1x5x128xbf16>
    %51 = vector.shape_cast %50 : vector<1x5x128xbf16> to vector<5x128xbf16>
    %c0_65 = arith.constant 0 : index
    %c0_66 = arith.constant 0 : index
    %52 = vector.load %arg4[%c0_65, %c0_66] : memref<8x64xf32, #tpu.memory_space<vmem>>, vector<5x64xf32>
    %c6 = arith.constant 6 : index
    %c0_67 = arith.constant 0 : index
    %c0_68 = arith.constant 0 : index
    %53 = vector.load %arg2[%c6, %c0_67, %c0_68] : memref<7x128x64xbf16, #tpu.memory_space<vmem>>, vector<1x128x64xbf16>
    %54 = vector.shape_cast %53 : vector<1x128x64xbf16> to vector<128x64xbf16>
    %cst_69 = arith.constant dense<0.000000e+00> : vector<5x64xf32>
    %55 = tpu.matmul %51, %54, %cst_69 {dimension_numbers = #tpu.dot_dimension_numbers<[1], [0], [0], [1], [0, 0, 1, 1], [], []>} : vector<5x128xbf16>, vector<128x64xbf16>, vector<5x64xf32> -> vector<5x64xf32>
    %56 = arith.addf %52, %55 : vector<5x64xf32>
    %c0_70 = arith.constant 0 : index
    %c0_71 = arith.constant 0 : index
    %57 = vector.load %arg4[%c0_70, %c0_71] : memref<8x64xf32, #tpu.memory_space<vmem>>, vector<5x64xf32>
    tpu.vector_store %arg4[%c0_70, %c0_71], %56 {strides = array<i32>} : memref<8x64xf32, #tpu.memory_space<vmem>>, vector<5x64xf32>,
    %c0_72 = arith.constant 0 : index
    %c0_73 = arith.constant 0 : index
    %58 = vector.load %arg4[%c0_72, %c0_73] : memref<8x64xf32, #tpu.memory_space<vmem>>, vector<8x64xf32>
    %59 = arith.negf %58 : vector<8x64xf32>
    %60 = math.exp %59 : vector<8x64xf32>
    %cst_74 = arith.constant 1.000000e+00 : f32
    %61 = vector.broadcast %cst_74 : f32 to vector<8x64xf32>
    %62 = arith.addf %61, %60 : vector<8x64xf32>
    %63 = arith.divf %61, %62 : vector<8x64xf32>
    %64 = arith.truncf %63 : vector<8x64xf32> to vector<8x64xbf16>
    %c0_75 = arith.constant 0 : index
    %c0_76 = arith.constant 0 : index
    %c0_77 = arith.constant 0 : index
    %65 = vector.load %arg3[%c0_75, %c0_76, %c0_77] : memref<1x8x64xbf16, #tpu.memory_space<vmem>>, vector<1x8x64xbf16>
    %66 = vector.shape_cast %65 : vector<1x8x64xbf16> to vector<8x64xbf16>
    %67 = vector.shape_cast %64 : vector<8x64xbf16> to vector<1x8x64xbf16>
    tpu.vector_store %arg3[%c0_75, %c0_76, %c0_77], %67 {strides = array<i32>} : memref<1x8x64xbf16, #tpu.memory_space<vmem>>, vector<1x8x64xbf16>,
    return
  }
  func.func @transform_0(%arg0: i32) -> (i32, i32, i32) {
    %c0_i32 = arith.constant 0 : i32
    %c0_i32_0 = arith.constant 0 : i32
    %c0_i32_1 = arith.constant 0 : i32
    return %arg0, %c0_i32, %c0_i32_0 : i32, i32, i32
  }
  func.func @transform_1(%arg0: i32) -> (i32, i32, i32) {
    %c0_i32 = arith.constant 0 : i32
    %c0_i32_0 = arith.constant 0 : i32
    %c0_i32_1 = arith.constant 0 : i32
    %c0_i32_2 = arith.constant 0 : i32
    return %c0_i32, %c0_i32_0, %c0_i32_1 : i32, i32, i32
  }
  func.func @transform_2(%arg0: i32) -> (i32, i32, i32) {
    %c0_i32 = arith.constant 0 : i32
    %c0_i32_0 = arith.constant 0 : i32
    %c0_i32_1 = arith.constant 0 : i32
    return %arg0, %c0_i32, %c0_i32_0 : i32, i32, i32
  }
}

module attributes {stable_mosaic.version = 11 : i64} {
  func.func @_apply_kernel(%arg0: i32, %arg1: i32, %arg2: memref<1x4x512xf32, #tpu.memory_space<vmem>>, %arg3: memref<1x1x512xbf16, #tpu.memory_space<vmem>>, %arg4: memref<1x4x512xf32, #tpu.memory_space<vmem>>) attributes {dimension_semantics = [#tpu.dimension_semantics<parallel>, #tpu.dimension_semantics<parallel>], iteration_bounds = array<i64: 2, 1>, scalar_prefetch = 0 : i64, scratch_operands = 0 : i64, tpu.core_type = #tpu.core_type<tc>, window_params = [{transform_indices = @transform_0, window_bounds = array<i64: 1, 4, 512>}, {transform_indices = @transform_1, window_bounds = array<i64: 1, 1, 512>}, {transform_indices = @transform_2, window_bounds = array<i64: 1, 4, 512>}]} {
    %c0 = arith.constant 0 : index
    %c0_0 = arith.constant 0 : index
    %c0_1 = arith.constant 0 : index
    %0 = vector.load %arg3[%c0, %c0_0, %c0_1] : memref<1x1x512xbf16, #tpu.memory_space<vmem>>, vector<1x1x512xbf16>
    %1 = vector.shape_cast %0 : vector<1x1x512xbf16> to vector<1x512xbf16>
    %2 = arith.extf %1 : vector<1x512xbf16> to vector<1x512xf32>
    %c0_2 = arith.constant 0 : index
    %c0_3 = arith.constant 0 : index
    %c0_4 = arith.constant 0 : index
    %3 = vector.load %arg2[%c0_2, %c0_3, %c0_4] : memref<1x4x512xf32, #tpu.memory_space<vmem>>, vector<1x4x512xf32>
    %4 = vector.shape_cast %3 : vector<1x4x512xf32> to vector<4x512xf32>
    %5 = vector.broadcast %2 : vector<1x512xf32> to vector<4x512xf32>
    %6 = arith.mulf %4, %5 : vector<4x512xf32>
    %c0_5 = arith.constant 0 : index
    %c0_6 = arith.constant 0 : index
    %c0_7 = arith.constant 0 : index
    %7 = vector.load %arg4[%c0_5, %c0_6, %c0_7] : memref<1x4x512xf32, #tpu.memory_space<vmem>>, vector<1x4x512xf32>
    %8 = vector.shape_cast %7 : vector<1x4x512xf32> to vector<4x512xf32>
    %9 = vector.shape_cast %6 : vector<4x512xf32> to vector<1x4x512xf32>
    tpu.vector_store %arg4[%c0_5, %c0_6, %c0_7], %9 {strides = array<i32>} : memref<1x4x512xf32, #tpu.memory_space<vmem>>, vector<1x4x512xf32>,
    return
  }
  func.func @transform_0(%arg0: i32, %arg1: i32) -> (i32, i32, i32) {
    %c0_i32 = arith.constant 0 : i32
    %c0_i32_0 = arith.constant 0 : i32
    return %arg0, %c0_i32, %arg1 : i32, i32, i32
  }
  func.func @transform_1(%arg0: i32, %arg1: i32) -> (i32, i32, i32) {
    %c0_i32 = arith.constant 0 : i32
    %c0_i32_0 = arith.constant 0 : i32
    return %arg0, %c0_i32, %arg1 : i32, i32, i32
  }
  func.func @transform_2(%arg0: i32, %arg1: i32) -> (i32, i32, i32) {
    %c0_i32 = arith.constant 0 : i32
    %c0_i32_0 = arith.constant 0 : i32
    return %arg0, %c0_i32, %arg1 : i32, i32, i32
  }
}

</mosaic_0001>

<bundles_post_ra>
// kernel: spatial_attention.3
= control target key start
LH: loop header
LB: loop body
LE: loop exit
PB: predicated region body
PF: predicated region fallthrough
CT: control target
= control target key end

     0   :  { %s329_s6 = smov 0   ;;  %s331_s7 = smov 0   ;;  %s362_s0 = inlined_call_operand.vmem [shape: f32[2,4,8,64], index: 0, kind: input, shape index: {}]   ;;  %s363_s1 = inlined_call_operand.vmem [shape: bf16[2,8,128], index: 1, kind: output, shape index: {}]  }
   0x1   :  { %s333_s8 = smov 0  }
   0x2 LB: > { %s23_s9 = sadd.s32 1, %s312_s7  ;;  %p260_p0 = scmp.ge.s32.totalorder %s316_s8, 1  ;;  %s316_s8 = sphi %s333_s8, %s11_s8   ;;  %s312_s7 = sphi %s331_s7, %s365_s7   ;;  %s308_s6 = sphi %s329_s6, %s364_s6  }
   0x3   : > { %p25_p1 = scmp.ge.s32.totalorder %s23_s9, 2  ;;  %p106_p2 = scmp.lt.s32.totalorder %s316_s8, 3 }
   0x5   : > { %s367_s9 = smov (%p25_p1, %s23_s9), 0  ;;  %p107_p3 = pnand %p260_p0, %p106_p2 }
   0x6   : > { %p131_p4 = scmp.lt.s32.totalorder (!%p107_p3), %s308_s6, 1  ;;  %vm150_vm0 = vcmask (!%p107_p3), 523264   ;;  %vm161_vm1 = vcmask (!%p107_p3), 519168   ;;  %s318_s18 = smov (!%p107_p3), 64   ;;  %vm177_vm2 = vcmask (!%p107_p3), 1043968  }
   0x7   : > { %110 = sbr.rel (%p107_p3) target bundleno = 143 (0x8f), region = 24 }
   0xe   : > { %s369_s6 = smov (!%p131_p4, %s308_s6), 1 }
   0xf   : > { %s267_s10 = sshll.u32 %s369_s6, 5  ;;  %s263_s14 = sshll.u32 %s369_s6, 2 }
  0x10   : > { %s138_s13 = scalar_lea.vmem %s362_s0, %s267_s10  ;;  %s145_s17 = scalar_lea.vmem %s363_s1, %s263_s14 }
  0x11   : > { %v146_v0 = vld [vmem:[%s138_s13] sm:$0xff]  ;;  %v147_v1 = vld [vmem:[%s138_s13 + $0x8] sm:$0xff]  ;;  %v148_v2 = vld [vmem:[%s138_s13 + $0x10] sm:$0xff] }
  0x12   : > { %v149_v3 = vld [vmem:[%s138_s13 + $0x18] sm:$0xff]  ;;  %v151_v4 = vsel %vm150_vm0, %v146_v0, 0.0  ;;  %v152_v5 = vsel %vm150_vm0, %v147_v1, 0.0  ;;  %v154_v6 = vsel %vm150_vm0, %v148_v2, 0.0  ;;  %v163_v7 = vsel %vm150_vm0, %v146_v0, -inf }
  0x13   : > { %v153_v8 = vadd.f32 %v152_v5, %v151_v4  ;;  %v164_v9 = vsel %vm150_vm0, %v147_v1, -inf  ;;  %v165_v10 = vsel %vm150_vm0, %v148_v2, -inf  ;;  %v156_v11 = vsel %vm150_vm0, %v149_v3, 0.0 }
  0x14   : > { %v166_v12 = vsel %vm150_vm0, %v149_v3, -inf  ;;  %v167_v13 = vmax.f32 %v163_v7, %v164_v9 }
  0x15   : > { %v155_v14 = vadd.f32 %v154_v6, %v153_v8  ;;  %v168_v15 = vmax.f32 %v165_v10, %v166_v12 }
  0x17   : > { %v157_v16 = vadd.f32 %v156_v11, %v155_v14  ;;  %v169_v17 = vmax.f32 %v167_v13, %v168_v15 }
  0x19   : > { %v159_v18 = vmul.f32 0.25, %v157_v16  ;;  %v268_v19 = vpack.c.bf16 %v169_v17, %v169_v17 }
  0x1b   : > { %v160_v20 = vpack.c.bf16 %v159_v18, %v159_v18  ;;  %174 = vrot.lane.b32.xlu0 %v268_v19, %s318_s18 }
  0x1d   : > { %162 = vst.msk [vmem:[%s145_s17] sm:$0xf] %vm161_vm1, %v160_v20 }
  0x8d   : > { %v175_v21 = vpop.permute.xlu0 %174 }
  0x8e   : > { %178 = vst.msk [vmem:[%s145_s17] sm:$0xf] %vm177_vm2, %v175_v21 }
  0x8f PF: > { %s11_s8 = sadd.s32 1, %s316_s8   ;;  %s364_s6 = smov %s312_s7 }
  0x90   : > { %p8_p5 = scmp.ge.s32.totalorder %s11_s8, 4   ;;  %s365_s7 = smov %s367_s9 }
  0x92   :  { %10 = sbr.rel (!%p8_p5) target bundleno = 2 (0x2), region = 54 }

// kernel: spatial_attention.4
= control target key start
LH: loop header
LB: loop body
LE: loop exit
PB: predicated region body
PF: predicated region fallthrough
CT: control target
= control target key end

     0   :  { %s1464_s9 = smov 0   ;;  %s1748_s0 = inlined_call_operand.vmem [shape: bf16[2,8,128], index: 0, kind: input, shape index: {}]   ;;  %s1749_s1 = inlined_call_operand.vmem [shape: bf16[7,128,64], index: 1, kind: input, shape index: {}]   ;;  %s1750_s2 = inlined_call_operand.vmem [shape: bf16[2,8,64], index: 2, kind: output, shape index: {}]  }
   0x1 LB: > { %s998_s10 = sadd.s32 4294967295, %s1445_s9   ;;  %p1002_p0 = scmp.ge.s32.totalorder %s1445_s9, 1  ;;  %s1445_s9 = sphi %s1464_s9, %s12_s9  }
   0x2   : > { %p111_p1 = scmp.lt.s32.totalorder %s1445_s9, 3 }
   0x4   : > { %p112_p2 = pnand %p1002_p0, %p111_p1 }
   0x5   : > { %v1376_v0 = vld [vmem:[%s1749_s1] sm:$0xff] (!%p112_p2)   ;;  %v1447_v1 = vmov (!%p112_p2), 0.0   ;;  %v1377_v2 = vld [vmem:[%s1749_s1 + $0x8] sm:$0xff] (!%p112_p2)   ;;  %vm1448_vm0 = vmmov (!%p112_p2), 0   ;;  %vm140_vm1 = vcmask (!%p112_p2), 523264   ;;  %v1378_v5 = vld [vmem:[%s1749_s1 + $0x10] sm:$0xff] (!%p112_p2)  }
   0x6   : > { %115 = sbr.rel (%p112_p2) target bundleno = 385 (0x181), region = 28  ;;  %1226 = vmatprep.subr.bf16.mxu0 (!%p112_p2), %v1447_v1  ;;  %1246 = vmatprep.subr.bf16.mxu1 (!%p112_p2), %v1447_v1  ;;  %v1379_v3 = vld [vmem:[%s1749_s1 + $0x40] sm:$0xff] (!%p112_p2)   ;;  %141 = vst.msk [vmem:[#allocation2] sm:$0xff] (!%p112_p2), %vm140_vm1, %v1447_v1  ;;  %v1381_v4 = vld [vmem:[%s1749_s1 + $0x48] sm:$0xff] (!%p112_p2)   ;;  %v1383_v6 = vld [vmem:[%s1749_s1 + $0x50] sm:$0xff] (!%p112_p2)   ;;  %p131_p3 = scmp.lt.s32.totalorder (!%p112_p2), %s998_s10, 1 }
   0x7   : > { %1227 = vmatpush3.bf16.msra.mxu0 (!%p112_p2), %v1376_v0  ;;  %1242 = vmatprep.mubr.msk.bf16.mxu0 (!%p112_p2), %vm1448_vm0, %v1447_v1  ;;  %v1380_v7 = vld [vmem:[%s1749_s1 + $0x18] sm:$0xff] (!%p112_p2)   ;;  %v1382_v9 = vld [vmem:[%s1749_s1 + $0x20] sm:$0xff] (!%p112_p2)   ;;  %v1384_v11 = vld [vmem:[%s1749_s1 + $0x28] sm:$0xff] (!%p112_p2)   ;;  %vm249_vm2 = vcmask (!%p112_p2), 520192   ;;  %vm359_vm3 = vcmask (!%p112_p2), 521216   ;;  %vm469_vm4 = vcmask (!%p112_p2), 522240  }
   0x8   : > { %1228 = vmatprep.subr.bf16.mxu0 (!%p112_p2), %v1447_v1  ;;  %1262 = vmatprep.mubr.msk.bf16.mxu1 (!%p112_p2), %vm1448_vm0, %v1447_v1  ;;  %v1385_v8 = vld [vmem:[%s1749_s1 + $0x58] sm:$0xff] (!%p112_p2)   ;;  %v1387_v10 = vld [vmem:[%s1749_s1 + $0x60] sm:$0xff] (!%p112_p2)   ;;  %v1389_v12 = vld [vmem:[%s1749_s1 + $0x68] sm:$0xff] (!%p112_p2)   ;;  %vm943_vm5 = vcmask (!%p112_p2), 519168  }
   0x9   : > { %1247 = vmatpush3.bf16.msra.mxu1 (!%p112_p2), %v1379_v3  ;;  %v1386_v13 = vld [vmem:[%s1749_s1 + $0x30] sm:$0xff] (!%p112_p2)   ;;  %v1388_v15 = vld [vmem:[%s1749_s1 + $0x38] sm:$0xff] (!%p112_p2)   ;;  %v1390_v18 = vld [vmem:[%s1749_s1 + $0x80] sm:$0xff] (!%p112_p2)  }
   0xa   : > { %1248 = vmatprep.subr.bf16.mxu1 (!%p112_p2), %v1447_v1  ;;  %v1391_v14 = vld [vmem:[%s1749_s1 + $0x70] sm:$0xff] (!%p112_p2)   ;;  %v1393_v16 = vld [vmem:[%s1749_s1 + $0x78] sm:$0xff] (!%p112_p2)   ;;  %v1395_v20 = vld [vmem:[%s1749_s1 + $0xc0] sm:$0xff] (!%p112_p2)  }
   0xb   : > { %1229 = vmatpush3.bf16.msra.mxu0 (!%p112_p2), %v1377_v2  ;;  %v1392_v21 = vld [vmem:[%s1749_s1 + $0x88] sm:$0xff] (!%p112_p2)   ;;  %v1394_v23 = vld [vmem:[%s1749_s1 + $0x90] sm:$0xff] (!%p112_p2)   ;;  %v1396_v25 = vld [vmem:[%s1749_s1 + $0x98] sm:$0xff] (!%p112_p2)  }
   0xc   : > { %1230 = vmatprep.subr.bf16.mxu0 (!%p112_p2), %v1447_v1  ;;  %v1397_v22 = vld [vmem:[%s1749_s1 + $0xc8] sm:$0xff] (!%p112_p2)   ;;  %v1399_v24 = vld [vmem:[%s1749_s1 + $0xd0] sm:$0xff] (!%p112_p2)   ;;  %v1401_v26 = vld [vmem:[%s1749_s1 + $0xd8] sm:$0xff] (!%p112_p2)  }
   0xd   : > { %1249 = vmatpush3.bf16.msra.mxu1 %v1381_v4  ;;  %s1752_s10 = smov (!%p131_p3, %s998_s10), 1  ;;  %v1398_v27 = vld [vmem:[%s1749_s1 + $0xa0] sm:$0xff]   ;;  %v1400_v29 = vld [vmem:[%s1749_s1 + $0xa8] sm:$0xff]   ;;  %v1402_v31 = vld [vmem:[%s1749_s1 + $0xb0] sm:$0xff]  }
   0xe   : > { %1250 = vmatprep.subr.bf16.mxu1 %v1447_v1  ;;  %s1003_s11 = sshll.u32 %s1752_s10, 2  ;;  %v1403_v28 = vld [vmem:[%s1749_s1 + $0xe0] sm:$0xff]   ;;  %v1405_v30 = vld [vmem:[%s1749_s1 + $0xe8] sm:$0xff]   ;;  %v1407_v32 = vld [vmem:[%s1749_s1 + $0xf0] sm:$0xff]  }
   0xf   : > { %1231 = vmatpush3.bf16.msra.mxu0 %v1378_v5  ;;  %s1550_s18 = scalar_lea.vmem %s1748_s0, %s1003_s11  ;;  %v1404_v33 = vld [vmem:[%s1749_s1 + $0xb8] sm:$0xff]   ;;  %v1406_v36 = vld [vmem:[%s1749_s1 + $0x100] sm:$0xff]   ;;  %v1408_v39 = vld [vmem:[%s1749_s1 + $0x108] sm:$0xff]   ;;  %s138_s30 = scalar_lea.vmem %s1750_s2, %s1003_s11 }
  0x10   : > { %1232 = vmatprep.subr.bf16.mxu0 %v1447_v1  ;;  %v142_v17 = vld [vmem:[%s1550_s18] sm:$0x7]  ;;  %v1409_v34 = vld [vmem:[%s1749_s1 + $0xf8] sm:$0xff]   ;;  %v1413_v40 = vld [vmem:[%s1749_s1 + $0x148] sm:$0xff]  }
  0x11   : > { %1251 = vmatpush3.bf16.msra.mxu1 %v1383_v6  ;;  %v251_v19 = vld [vmem:[%s1550_s18] sm:$0x7]  ;;  %v1410_v41 = vld [vmem:[%s1749_s1 + $0x110] sm:$0xff]   ;;  %v1412_v43 = vld [vmem:[%s1749_s1 + $0x118] sm:$0xff]  }
  0x12   : > { %1252 = vmatprep.subr.bf16.mxu1 %v1447_v1  ;;  %v361_v35 = vld [vmem:[%s1550_s18] sm:$0xf]  ;;  %v1415_v42 = vld [vmem:[%s1749_s1 + $0x150] sm:$0xff]   ;;  %v1417_v44 = vld [vmem:[%s1749_s1 + $0x158] sm:$0xff]  }
  0x13   : > { %1233 = vmatpush3.bf16.msra.mxu0 %v1380_v7  ;;  %v471_v37 = vld [vmem:[%s1550_s18] sm:$0xf]  ;;  %v1416_v48 = vld [vmem:[%s1749_s1 + $0x128] sm:$0xff]   ;;  %v1418_v51 = vld [vmem:[%s1749_s1 + $0x130] sm:$0xff]  }
  0x14   : > { %1234 = vmatprep.subr.bf16.mxu0 %v1447_v1  ;;  %v1411_v38 = vld [vmem:[%s1749_s1 + $0x140] sm:$0xff]   ;;  %v1421_v49 = vld [vmem:[%s1749_s1 + $0x168] sm:$0xff]   ;;  %v1424_v54 = vld [vmem:[%s1749_s1 + $0x170] sm:$0xff]  }
  0x15   : > { %1253 = vmatpush3.bf16.msra.mxu1 %v1385_v8  ;;  %v1414_v45 = vld [vmem:[%s1749_s1 + $0x120] sm:$0xff]   ;;  %v1420_v55 = vld [vmem:[%s1749_s1 + $0x138] sm:$0xff]   ;;  %v1425_v61 = vld [vmem:[%s1749_s1 + $0x188] sm:$0xff]  }
  0x16   : > { %1254 = vmatprep.subr.bf16.mxu1 %v1447_v1  ;;  %v1419_v46 = vld [vmem:[%s1749_s1 + $0x160] sm:$0xff]   ;;  %v1426_v58 = vld [vmem:[%s1749_s1 + $0x178] sm:$0xff]   ;;  %v1427_v62 = vld [vmem:[%s1749_s1 + $0x190] sm:$0xff]  }
  0x17   : > { %1235 = vmatpush3.bf16.msra.mxu0 %v1382_v9  ;;  %v1422_v47 = vld [vmem:[%s1550_s18] ss:$0 sps:$4 sm:$0xff]   ;;  %v1429_v63 = vld [vmem:[%s1749_s1 + $0x198] sm:$0xff]   ;;  %v1431_v3 = vld [vmem:[%s1749_s1 + $0x1a8] sm:$0xff]  }
  0x18   : > { %1236 = vmatprep.subr.bf16.mxu0 %v1447_v1  ;;  %v605_v50 = vshll.u32 %v1422_v47, 16  ;;  %v603_v52 = vshrl.u32 %v1422_v47, 16  ;;  %v1428_v56 = vld [vmem:[%s1550_s18] ss:$0 sps:$4 sm:$0xee]   ;;  %v1432_v6 = vld [vmem:[%s1749_s1 + $0x1b0] sm:$0xff]  }
  0x19   : > { %1255 = vmatpush3.bf16.msra.mxu1 %v1387_v10  ;;  %v1423_v59 = vld [vmem:[%s1749_s1 + $0x180] sm:$0xff]   ;;  %v722_v60 = vrot.slane %v1428_v56, 1  ;;  %v1433_v9 = vld [vmem:[%s1749_s1 + $0x1b8] sm:$0xff]  }
  0x1a   : > { %1256 = vmatprep.subr.bf16.mxu1 %v1447_v1  ;;  %v607_v53 = vrot.slane %v605_v50, 1  ;;  %v1430_v0 = vld [vmem:[%s1749_s1 + $0x1a0] sm:$0xff]  }
  0x1b   : > { %1237 = vmatpush3.bf16.msra.mxu0 %v1384_v11  ;;  %v1434_v2 = vld [vmem:[%s1550_s18] ss:$0 sps:$4 sm:$0xee]   ;;  %v143_v11 = vld [vmem:[#allocation2 + $0x3] sm:$0x1f] }
  0x1c   : > { %1238 = vmatprep.subr.bf16.mxu0 %v1447_v1  ;;  %v608_v57 = vor.u32 %v607_v53, %v603_v52  ;;  %v837_v4 = vshrl.u32 %v1434_v2, 16  ;;  %v840_v5 = vshll.u32 %v1434_v2, 16 }
  0x1d   : > { %1257 = vmatpush3.bf16.msra.mxu1 %v1389_v12 }
  0x1e   : > { %1258 = vmatprep.subr.bf16.mxu1 %v1447_v1  ;;  %v839_v7 = vrot.slane %v837_v4, 1  ;;  %v842_v8 = vrot.slane %v840_v5, 2 }
  0x1f   : > { %1239 = vmatpush3.bf16.msra.mxu0 %v1386_v13 }
  0x20   : > { %1240 = vmatprep.subr.bf16.mxu0 %v1447_v1  ;;  %v843_v10 = vor.u32 %v842_v8, %v839_v7 }
  0x21   : > { %1259 = vmatpush3.bf16.msra.mxu1 %v1391_v14 }
  0x22   : > { %1260 = vmatprep.subr.bf16.mxu1 %v1447_v1 }
  0x23   : > { %1241 = vmatpush3.bf16.msra.mxu0 %v1388_v15 }
  0x24   : > { %1266 = vmatprep.subr.bf16.mxu0 %v1447_v1 }
  0x25   : > { %1261 = vmatpush3.bf16.msra.mxu1 %v1393_v16 }
  0x26   : > { %1243 = vmatmul.mubr.bf16.vlgmr.msra.gmra.mrb[0].mxu0 %v142_v17  ;;  %1286 = vmatprep.subr.bf16.mxu1 %v1447_v1 }
  0x27   : > { %1267 = vmatpush3.bf16.msra.mxu0 %v1390_v18  ;;  %1282 = vmatprep.mubr.msk.bf16.mxu0 %vm1448_vm0, %v1447_v1 }
  0x28   : > { %1268 = vmatprep.subr.bf16.mxu0 %v1447_v1  ;;  %1263 = vmatmul.mubr.bf16.vlgmr.msra.gmra.mrb[0].mxu1 %v251_v19 }
  0x29   : > { %1287 = vmatpush3.bf16.msra.mxu1 %v1395_v20  ;;  %1302 = vmatprep.mubr.msk.bf16.mxu1 %vm1448_vm0, %v1447_v1 }
  0x2a   : > { %1288 = vmatprep.subr.bf16.mxu1 %v1447_v1 }
  0x2b   : > { %1269 = vmatpush3.bf16.msra.mxu0 %v1392_v21 }
  0x2c   : > { %1270 = vmatprep.subr.bf16.mxu0 %v1447_v1 }
  0x2d   : > { %1289 = vmatpush3.bf16.msra.mxu1 %v1397_v22 }
  0x2e   : > { %1290 = vmatprep.subr.bf16.mxu1 %v1447_v1 }
  0x2f   : > { %1271 = vmatpush3.bf16.msra.mxu0 %v1394_v23 }
  0x30   : > { %1272 = vmatprep.subr.bf16.mxu0 %v1447_v1 }
  0x31   : > { %1291 = vmatpush3.bf16.msra.mxu1 %v1399_v24 }
  0x32   : > { %1292 = vmatprep.subr.bf16.mxu1 %v1447_v1 }
  0x33   : > { %1273 = vmatpush3.bf16.msra.mxu0 %v1396_v25 }
  0x34   : > { %1274 = vmatprep.subr.bf16.mxu0 %v1447_v1 }
  0x35   : > { %1293 = vmatpush3.bf16.msra.mxu1 %v1401_v26 }
  0x36   : > { %1294 = vmatprep.subr.bf16.mxu1 %v1447_v1 }
  0x37   : > { %1275 = vmatpush3.bf16.msra.mxu0 %v1398_v27 }
  0x38   : > { %1276 = vmatprep.subr.bf16.mxu0 %v1447_v1 }
  0x39   : > { %1295 = vmatpush3.bf16.msra.mxu1 %v1403_v28 }
  0x3a   : > { %1296 = vmatprep.subr.bf16.mxu1 %v1447_v1 }
  0x3b   : > { %1277 = vmatpush3.bf16.msra.mxu0 %v1400_v29 }
  0x3c   : > { %1278 = vmatprep.subr.bf16.mxu0 %v1447_v1 }
  0x3d   : > { %1297 = vmatpush3.bf16.msra.mxu1 %v1405_v30 }
  0x3e   : > { %1298 = vmatprep.subr.bf16.mxu1 %v1447_v1 }
  0x3f   : > { %1279 = vmatpush3.bf16.msra.mxu0 %v1402_v31 }
  0x40   : > { %1280 = vmatprep.subr.bf16.mxu0 %v1447_v1 }
  0x41   : > { %1299 = vmatpush3.bf16.msra.mxu1 %v1407_v32 }
  0x42   : > { %1300 = vmatprep.subr.bf16.mxu1 %v1447_v1 }
  0x43   : > { %1281 = vmatpush3.bf16.msra.mxu0 %v1404_v33 }
  0x44   : > { %1306 = vmatprep.subr.bf16.mxu0 %v1447_v1 }
  0x45   : > { %1301 = vmatpush3.bf16.msra.mxu1 %v1409_v34 }
  0x46   : > { %1283 = vmatmul.mubr.bf16.vlgmr.msra.gmra.mrb[4].mxu0 %v361_v35  ;;  %1326 = vmatprep.subr.bf16.mxu1 %v1447_v1 }
  0x47   : > { %1307 = vmatpush3.bf16.msra.mxu0 %v1406_v36  ;;  %1322 = vmatprep.mubr.msk.bf16.mxu0 %vm1448_vm0, %v1447_v1 }
  0x48   : > { %1308 = vmatprep.subr.bf16.mxu0 %v1447_v1  ;;  %1303 = vmatmul.mubr.bf16.vlgmr.msra.gmra.mrb[4].mxu1 %v471_v37 }
  0x49   : > { %1327 = vmatpush3.bf16.msra.mxu1 %v1411_v38  ;;  %1342 = vmatprep.mubr.msk.bf16.mxu1 %vm1448_vm0, %v1447_v1 }
  0x4a   : > { %1328 = vmatprep.subr.bf16.mxu1 %v1447_v1 }
  0x4b   : > { %1309 = vmatpush3.bf16.msra.mxu0 %v1408_v39 }
  0x4c   : > { %1310 = vmatprep.subr.bf16.mxu0 %v1447_v1 }
  0x4d   : > { %1329 = vmatpush3.bf16.msra.mxu1 %v1413_v40 }
  0x4e   : > { %1330 = vmatprep.subr.bf16.mxu1 %v1447_v1 }
  0x4f   : > { %1311 = vmatpush3.bf16.msra.mxu0 %v1410_v41 }
  0x50   : > { %1312 = vmatprep.subr.bf16.mxu0 %v1447_v1 }
  0x51   : > { %1331 = vmatpush3.bf16.msra.mxu1 %v1415_v42 }
  0x52   : > { %1332 = vmatprep.subr.bf16.mxu1 %v1447_v1 }
  0x53   : > { %1313 = vmatpush3.bf16.msra.mxu0 %v1412_v43 }
  0x54   : > { %1314 = vmatprep.subr.bf16.mxu0 %v1447_v1 }
  0x55   : > { %1333 = vmatpush3.bf16.msra.mxu1 %v1417_v44 }
  0x56   : > { %1334 = vmatprep.subr.bf16.mxu1 %v1447_v1 }
  0x57   : > { %1315 = vmatpush3.bf16.msra.mxu0 %v1414_v45 }
  0x58   : > { %1316 = vmatprep.subr.bf16.mxu0 %v1447_v1 }
  0x59   : > { %1335 = vmatpush3.bf16.msra.mxu1 %v1419_v46 }
  0x5a   : > { %1336 = vmatprep.subr.bf16.mxu1 %v1447_v1 }
  0x5b   : > { %1317 = vmatpush3.bf16.msra.mxu0 %v1416_v48 }
  0x5c   : > { %1318 = vmatprep.subr.bf16.mxu0 %v1447_v1 }
  0x5d   : > { %1337 = vmatpush3.bf16.msra.mxu1 %v1421_v49 }
  0x5e   : > { %1338 = vmatprep.subr.bf16.mxu1 %v1447_v1 }
  0x5f   : > { %1319 = vmatpush3.bf16.msra.mxu0 %v1418_v51 }
  0x60   : > { %1320 = vmatprep.subr.bf16.mxu0 %v1447_v1 }
  0x61   : > { %1339 = vmatpush3.bf16.msra.mxu1 %v1424_v54 }
  0x62   : > { %1340 = vmatprep.subr.bf16.mxu1 %v1447_v1 }
  0x63   : > { %1321 = vmatpush3.bf16.msra.mxu0 %v1420_v55 }
  0x64   : > { %1346 = vmatprep.subr.bf16.mxu0 %v1447_v1 }
  0x65   : > { %1341 = vmatpush3.bf16.msra.mxu1 %v1426_v58 }
  0x66   : > { %1323 = vmatmul.mubr.bf16.vlgmr.msra.gmra.mrb[8].mxu0 %v608_v57 }
  0x67   : > { %1347 = vmatpush3.bf16.msra.mxu0 %v1423_v59  ;;  %1362 = vmatprep.mubr.msk.bf16.mxu0 %vm1448_vm0, %v1447_v1 }
  0x68   : > { %1348 = vmatprep.subr.bf16.mxu0 %v1447_v1  ;;  %1343 = vmatmul.mubr.bf16.vlgmr.msra.gmra.mrb[8].mxu1 %v722_v60 }
  0x6b   : > { %1349 = vmatpush3.bf16.msra.mxu0 %v1425_v61 }
  0x6c   : > { %1350 = vmatprep.subr.bf16.mxu0 %v1447_v1 }
  0x6f   : > { %1351 = vmatpush3.bf16.msra.mxu0 %v1427_v62 }
  0x70   : > { %1352 = vmatprep.subr.bf16.mxu0 %v1447_v1 }
  0x73   : > { %1353 = vmatpush3.bf16.msra.mxu0 %v1429_v63 }
  0x74   : > { %1354 = vmatprep.subr.bf16.mxu0 %v1447_v1 }
  0x77   : > { %1355 = vmatpush3.bf16.msra.mxu0 %v1430_v0 }
  0x78   : > { %1356 = vmatprep.subr.bf16.mxu0 %v1447_v1 }
  0x7b   : > { %1357 = vmatpush3.bf16.msra.mxu0 %v1431_v3 }
  0x7c   : > { %1358 = vmatprep.subr.bf16.mxu0 %v1447_v1 }
  0x7f   : > { %1359 = vmatpush3.bf16.msra.mxu0 %v1432_v6 }
  0x80   : > { %1360 = vmatprep.subr.bf16.mxu0 %v1447_v1 }
  0x83   : > { %1361 = vmatpush3.bf16.msra.mxu0 %v1433_v9 }
  0x86   : > { %1363 = vmatmul.mubr.bf16.vlgmr.msra.gmra.mrb[12].mxu0 %v843_v10 }
  0xf9   : > { %v242_v12 = vpop.f32.mrb[0].mxu0 }
  0xfa   : > { %v248_v13 = vadd.f32 %v242_v12, %v143_v11  ;;  %v1244_v14 = vpop.f32.mrb[1].mxu0 }
  0xfb   : > { %v245_v15 = vpop.f32.mrb[2].mxu0  ;;  %v352_v17 = vpop.f32.mrb[0].mxu1 }
  0xfc   : > { %250 = vst.msk [vmem:[#allocation2 + $0x3] sm:$0x1f] %vm249_vm2, %v248_v13  ;;  %v1245_v16 = vpop.f32.mrb[3].mxu0  ;;  %v1264_v18 = vpop.f32.mrb[1].mxu1 }
  0xfd   : > { %v355_v19 = vpop.f32.mrb[2].mxu1 }
  0xfe   : > { %v1265_v20 = vpop.f32.mrb[3].mxu1 }
 0x103   : > { %v252_v21 = vld [vmem:[#allocation2 + $0x2] sm:$0x3f] }
 0x104   : > { %v358_v22 = vadd.f32 %v352_v17, %v252_v21 }
 0x106   : > { %360 = vst.msk [vmem:[#allocation2 + $0x2] sm:$0x3f] %vm359_vm3, %v358_v22 }
 0x10d   : > { %v362_v1 = vld [vmem:[#allocation2 + $0x1] sm:$0x7f] }
 0x119   : > { %v462_v23 = vpop.f32.mrb[4].mxu0 }
 0x11a   : > { %v468_v24 = vadd.f32 %v462_v23, %v362_v1  ;;  %v1284_v25 = vpop.f32.mrb[5].mxu0 }
 0x11b   : > { %v465_v26 = vpop.f32.mrb[6].mxu0  ;;  %v572_v28 = vpop.f32.mrb[4].mxu1 }
 0x11c   : > { %470 = vst.msk [vmem:[#allocation2 + $0x1] sm:$0x7f] %vm469_vm4, %v468_v24  ;;  %v1285_v27 = vpop.f32.mrb[7].mxu0  ;;  %v1304_v29 = vpop.f32.mrb[5].mxu1 }
 0x11d   : > { %v575_v30 = vpop.f32.mrb[6].mxu1 }
 0x11e   : > { %v1305_v31 = vpop.f32.mrb[7].mxu1 }
 0x123   : > { %v472_v32 = vld [vmem:[#allocation2] sm:$0xff] }
 0x124   : > { %v578_v33 = vadd.f32 %v572_v28, %v472_v32 }
 0x126   : > { %579 = vst.msk [vmem:[#allocation2] sm:$0xff] %vm140_vm1, %v578_v33 }
 0x12d   : > { %v581_v34 = vld [vmem:[#allocation2] sm:$0x7f] }
 0x139   : > { %v692_v35 = vpop.f32.mrb[8].mxu0 }
 0x13a   : > { %v698_v36 = vadd.f32 %v692_v35, %v581_v34  ;;  %v1324_v37 = vpop.f32.mrb[9].mxu0 }
 0x13b   : > { %v695_v38 = vpop.f32.mrb[10].mxu0  ;;  %v806_v40 = vpop.f32.mrb[8].mxu1 }
 0x13c   : > { %699 = vst.msk [vmem:[#allocation2] sm:$0x7f] %vm469_vm4, %v698_v36  ;;  %v1325_v39 = vpop.f32.mrb[11].mxu0  ;;  %v1344_v41 = vpop.f32.mrb[9].mxu1 }
 0x13d   : > { %v809_v42 = vpop.f32.mrb[10].mxu1 }
 0x13e   : > { %v1345_v43 = vpop.f32.mrb[11].mxu1 }
 0x143   : > { %v701_v44 = vld [vmem:[#allocation2] sm:$0x3f] }
 0x144   : > { %v812_v45 = vadd.f32 %v806_v40, %v701_v44 }
 0x146   : > { %813 = vst.msk [vmem:[#allocation2] sm:$0x3f] %vm359_vm3, %v812_v45 }
 0x14d   : > { %v815_v46 = vld [vmem:[#allocation2] sm:$0x1f] }
 0x159   : > { %v927_v47 = vpop.f32.mrb[12].mxu0 }
 0x15a   : > { %v933_v48 = vadd.f32 %v927_v47, %v815_v46  ;;  %v1364_v49 = vpop.f32.mrb[13].mxu0 }
 0x15b   : > { %v930_v50 = vpop.f32.mrb[14].mxu0 }
 0x15c   : > { %934 = vst.msk [vmem:[#allocation2] sm:$0x1f] %vm249_vm2, %v933_v48  ;;  %v1365_v51 = vpop.f32.mrb[15].mxu0 }
 0x163   : > { %v935_v52 = vld [vmem:[#allocation2] sm:$0xff] }
 0x164   : > { %v1160_v53 = vmul.f32 -1.442695, %v935_v52 }
 0x166   : > { %1435 = vpow2.f32 %v1160_v53 }
 0x170   : > { %v1436_v54 = vpop.eup %1435 }
 0x171   : > { %v939_v55 = vadd.f32 1.0, %v1436_v54 }
 0x173   : > { %1437 = vrcp.f32 %v939_v55 }
 0x17d   : > { %v1438_v56 = vpop.eup %1437 }
 0x17e   : > { %v942_v57 = vpack.c.bf16 %v1438_v56, %v1438_v56 }
 0x180   : > { %944 = vst.msk [vmem:[%s138_s30] sm:$0xf] %vm943_vm5, %v942_v57 }
 0x181 PF: > { %s12_s9 = sadd.s32 1, %s1445_s9  }
 0x182   : > { %p9_p4 = scmp.ge.s32.totalorder %s12_s9, 4  }
 0x184   :  { %11 = sbr.rel (!%p9_p4) target bundleno = 1 (0x1), region = 64 }

// kernel: spatial_attention.5
= control target key start
LH: loop header
LB: loop body
LE: loop exit
PB: predicated region body
PF: predicated region fallthrough
CT: control target
= control target key end

     0   :  { %s448_s9 = smov 0   ;;  %s450_s10 = smov 0   ;;  %s484_s0 = inlined_call_operand.vmem [shape: f32[2,4,512], index: 0, kind: input, shape index: {}]   ;;  %s485_s1 = inlined_call_operand.vmem [shape: bf16[2,1,512], index: 1, kind: input, shape index: {}]   ;;  %s486_s2 = inlined_call_operand.vmem [shape: f32[2,4,512], index: 2, kind: output, shape index: {}]  }
   0x1   :  { %s452_s11 = smov 0  }
   0x2 LB: > { %s24_s12 = sadd.s32 1, %s427_s10  ;;  %p375_p0 = scmp.ge.s32.totalorder %s431_s11, 1  ;;  %s431_s11 = sphi %s452_s11, %s12_s11   ;;  %s427_s10 = sphi %s450_s10, %s488_s10   ;;  %s423_s9 = sphi %s448_s9, %s487_s9  }
   0x3   : > { %p26_p1 = scmp.ge.s32.totalorder %s24_s12, 2  ;;  %p149_p2 = scmp.lt.s32.totalorder %s431_s11, 3 }
   0x5   : > { %s490_s12 = smov (%p26_p1, %s24_s12), 0  ;;  %p150_p3 = pnand %p375_p0, %p149_p2 }
   0x6   : > { %p188_p4 = scmp.lt.s32.totalorder (!%p150_p3), %s423_s9, 1  ;;  %v221_v0 = vlaneseq (!%p150_p3) }
   0x7   : > { %153 = sbr.rel (%p150_p3) target bundleno = 29 (0x1d), region = 28 }
   0x8   : > { %v222_v1 = vshrl.u32 (!%p150_p3), %v221_v0, 7 }
   0xa   : > { %v223_v2 = vsub.s32 (!%p150_p3), 0, %v222_v1  ;;  %v227_v3 = vsub.s32 (!%p150_p3), 2, %v222_v1  ;;  %v231_v4 = vsub.s32 (!%p150_p3), 4, %v222_v1  ;;  %v235_v5 = vsub.s32 (!%p150_p3), 6, %v222_v1 }
   0xe   : > { %s492_s9 = smov (!%p188_p4, %s423_s9), 1 }
   0xf   : > { %s378_s13 = sshll.u32 %s492_s9, 2  ;;  %s383_s17 = sshll.u32 %s492_s9, 4 }
  0x10   : > { %s204_s16 = scalar_lea.vmem %s485_s1, %s378_s13  ;;  %s195_s20 = scalar_lea.vmem %s484_s0, %s383_s17 }
  0x11   : > { %v216_v6 = vld [vmem:[%s204_s16] sm:$0xf]  ;;  %v219_v17 = vld [vmem:[%s195_s20 + $0x8] sm:$0xff]  ;;  %s214_s23 = scalar_lea.vmem %s486_s2, %s383_s17 }
  0x12   : > { %v217_v7 = vunpack.c.l.bf16 %v216_v6  ;;  %v218_v16 = vld [vmem:[%s195_s20] sm:$0xff] }
  0x14   : > { %v224_v8 = vrot.slane %v217_v7, %v223_v2  ;;  %v228_v9 = vrot.slane %v217_v7, %v227_v3  ;;  %v232_v10 = vrot.slane %v217_v7, %v231_v4  ;;  %v236_v11 = vrot.slane %v217_v7, %v235_v5 }
  0x16   : > { %v244_v12 = vrot.slane %v224_v8, %v223_v2  ;;  %v248_v13 = vrot.slane %v228_v9, %v223_v2  ;;  %v252_v14 = vrot.slane %v232_v10, %v223_v2  ;;  %v256_v15 = vrot.slane %v236_v11, %v223_v2 }
  0x18   : > { %v261_v18 = vcombine.low %v244_v12, %v248_v13  ;;  %v262_v19 = vcombine.low %v252_v14, %v256_v15 }
  0x1a   : > { %v265_v20 = vmul.f32 %v261_v18, %v218_v16  ;;  %v266_v21 = vmul.f32 %v262_v19, %v219_v17 }
  0x1c   : > { %267 = vst [vmem:[%s214_s23] sm:$0xff] %v265_v20  ;;  %268 = vst [vmem:[%s214_s23 + $0x8] sm:$0xff] %v266_v21 }
  0x1d PF: > { %s12_s11 = sadd.s32 1, %s431_s11   ;;  %s487_s9 = smov %s427_s10 }
  0x1e   : > { %p9_p5 = scmp.ge.s32.totalorder %s12_s11, 4   ;;  %s488_s10 = smov %s490_s12 }
  0x20   :  { %11 = sbr.rel (!%p9_p5) target bundleno = 2 (0x2), region = 61 }

</bundles_post_ra>
